<compile_context>
chip_gen: v6e
topology: v6e:2x2x1
jax: 0.10.0
libtpu: 0.0.40
codegen_flags: <defaults>
</compile_context>

<pallas_src>
import functools

import jax
import jax.numpy as jnp
from jax.experimental import pallas as pl
from jax.experimental.pallas import tpu as pltpu

H = 32            # h_size
C = 16            # cell.num_classes
DEG = 2           # max_output_degree
MAX_DEPTH = 2     # max_depth
PADW = 128        # lane-dense state/output width: [h | out | zero padding]
assert H + C <= PADW


def _round_up(x, m):
    return ((x + m - 1) // m) * m


def _tree_kernel(num_levels, enc_ref, wenc_ref, bh_ref,
                 ustack_ref, vcomb_ref, bcomb_ref, out_ref):
    # enc projection hoisted out of the level recurrence.
    enc_proj = (jnp.dot(enc_ref[...], wenc_ref[...],
                        preferred_element_type=jnp.float32) + bh_ref[...])
    ustack = ustack_ref[...]    # (PADW, H): rows = [U_h; U_o; 0]
    vcomb = vcomb_ref[...]      # (H, PADW): cols = [I_H | V | 0]
    bcomb = bcomb_ref[...]      # (1, PADW): [0 | b_o | 0]

    # Level 0 (apply_node_func_root): parent_h = parent_out = 0.
    h = jnp.tanh(enc_proj)
    state = jnp.dot(h, vcomb, preferred_element_type=jnp.float32) + bcomb
    out_ref[0, :, :] = state

    # Levels 1..max_depth: broadcast layout keeps parents row-aligned with
    # children, so each level is a single dense matmul over the state slab.
    for lvl in range(1, num_levels):
        pre = enc_proj + jnp.dot(state, ustack,
                                 preferred_element_type=jnp.float32)
        h = jnp.tanh(pre)
        state = jnp.dot(h, vcomb, preferred_element_type=jnp.float32) + bcomb
        out_ref[lvl, :, :] = state


def _forward_impl(encs, params, max_output_degree, max_depth):
    """Inference branch of TreeDecoder.forward, fully expanded to
    max_output_degree children per node down to max_depth."""
    # TODO(synk): cell.expand / filter2 prune children data-dependently per
    # predicted output; no clean Pallas equivalent — full-degree expansion here.
    b = encs.shape[0]
    num_levels = max_depth + 1
    leaves_per_root = max_output_degree ** max_depth
    n_leaf = b * leaves_per_root
    row_tile = min(256, _round_up(n_leaf, 8))
    n_pad = _round_up(n_leaf, row_tile)

    # One row per deepest-level slot; every slot carries its root's encoding.
    enc_bcast = jnp.repeat(encs, leaves_per_root, axis=0)
    enc_bcast = jnp.pad(enc_bcast, ((0, n_pad - n_leaf), (0, 0)))

    f32 = jnp.float32
    U_stack = jnp.concatenate(
        [params["U_h"], params["U_o"],
         jnp.zeros((PADW - H - C, H), f32)], axis=0)
    V_comb = jnp.concatenate(
        [jnp.eye(H, dtype=f32), params["V"],
         jnp.zeros((H, PADW - H - C), f32)], axis=1)
    b_comb = jnp.concatenate(
        [jnp.zeros((1, H), f32), params["b_o"],
         jnp.zeros((1, PADW - H - C), f32)], axis=1)

    kernel = functools.partial(_tree_kernel, num_levels)
    full = lambda shape: pl.BlockSpec(shape, lambda i: (0, 0))

    slab = pl.pallas_call(
        kernel,
        out_shape=jax.ShapeDtypeStruct((num_levels, n_pad, PADW), f32),
        grid=(n_pad // row_tile,),
        in_specs=[
            pl.BlockSpec((row_tile, H), lambda i: (i, 0)),   # enc_bcast rows
            full((H, H)),        # W_enc
            full((1, H)),        # b_h
            full((PADW, H)),     # [U_h; U_o; 0]
            full((H, PADW)),     # [I | V | 0]
            full((1, PADW)),     # [0 | b_o | 0]
        ],
        out_specs=pl.BlockSpec((num_levels, row_tile, PADW),
                               lambda i: (0, i, 0)),
        compiler_params=pltpu.CompilerParams(
            dimension_semantics=("parallel",)),
    )(enc_bcast, params["W_enc"], params["b_h"], U_stack, V_comb, b_comb)

    # Extract each level's real nodes (stride = leaf slots covered per node);
    # the strided order matches the breadth-first child ordering of the
    # original level-synchronous expansion.
    hs, outs = [], []
    for lvl in range(num_levels):
        stride = max_output_degree ** (max_depth - lvl)
        rows = slab[lvl, 0:n_leaf:stride, :]
        hs.append(rows[:, :H])
        outs.append(rows[:, H:H + C])
    return jnp.concatenate(hs, axis=0), jnp.concatenate(outs, axis=0)


tree_decoder_forward = jax.jit(_forward_impl, static_argnums=(2, 3))


def init_params(key):
    ks = jax.random.split(key, 5)
    scale = 0.1
    return {
        "W_enc": scale * jax.random.normal(ks[0], (H, H), jnp.float32),
        "U_h":   scale * jax.random.normal(ks[1], (H, H), jnp.float32),
        "U_o":   scale * jax.random.normal(ks[2], (C, H), jnp.float32),
        "b_h":   jnp.zeros((1, H), jnp.float32),
        "V":     scale * jax.random.normal(ks[3], (H, C), jnp.float32),
        "b_o":   jnp.zeros((1, C), jnp.float32),
    }


def _reference_forward(encs, params, max_output_degree, max_depth):
    """Pure-JAX reference of the same full-degree expansion."""
    def cell(enc, ph, po):
        pre = (enc @ params["W_enc"] + ph @ params["U_h"]
               + po @ params["U_o"] + params["b_h"])
        h = jnp.tanh(pre)
        return h, h @ params["V"] + params["b_o"]

    bsz = encs.shape[0]
    h, out = cell(encs, jnp.zeros((bsz, H), jnp.float32),
                  jnp.zeros((bsz, C), jnp.float32))
    enc = encs
    hs, outs = [h], [out]
    for _ in range(max_depth):
        enc = jnp.repeat(enc, max_output_degree, axis=0)
        ph = jnp.repeat(h, max_output_degree, axis=0)
        po = jnp.repeat(out, max_output_degree, axis=0)
        h, out = cell(enc, ph, po)
        hs.append(h)
        outs.append(out)
    return jnp.concatenate(hs, axis=0), jnp.concatenate(outs, axis=0)


if __name__ == "__main__":
    key = jax.random.PRNGKey(0)
    pkey, ekey = jax.random.split(key)
    params = init_params(pkey)
    encs = jax.random.normal(ekey, (2, H), jnp.float32)   # batch of 2 encodings

    all_h, all_out = tree_decoder_forward(encs, params, DEG, MAX_DEPTH)
    jax.block_until_ready(all_h)
    jax.block_until_ready(all_out)

    # total nodes = B * (1 + D + D^2) for max_depth=2, deg=2 -> 2*7 = 14
    assert all_h.shape == (14, H)
    assert all_out.shape == (14, C)

    ref_h, ref_out = _reference_forward(encs, params, DEG, MAX_DEPTH)
    assert jnp.allclose(all_h, ref_h, atol=1e-3, rtol=1e-3)
    assert jnp.allclose(all_out, ref_out, atol=1e-3, rtol=1e-3)
    print("KERNEL_OK")
</pallas_src>

<mosaic_0001>
module attributes {stable_mosaic.version = 11 : i64} {
  func.func @_tree_kernel(%arg0: i32, %arg1: memref<8x32xf32, #tpu.memory_space<vmem>>, %arg2: memref<32x32xf32, #tpu.memory_space<vmem>>, %arg3: memref<1x32xf32, #tpu.memory_space<vmem>>, %arg4: memref<128x32xf32, #tpu.memory_space<vmem>>, %arg5: memref<32x128xf32, #tpu.memory_space<vmem>>, %arg6: memref<1x128xf32, #tpu.memory_space<vmem>>, %arg7: memref<3x8x128xf32, #tpu.memory_space<vmem>>) attributes {dimension_semantics = [#tpu.dimension_semantics<parallel>], iteration_bounds = array<i64: 1>, scalar_prefetch = 0 : i64, scratch_operands = 0 : i64, tpu.core_type = #tpu.core_type<tc>, window_params = [{transform_indices = @transform_0, window_bounds = array<i64: 8, 32>}, {pipeline_mode = #tpu.pipeline_mode<synchronous>, transform_indices = @transform_1, window_bounds = array<i64: 32, 32>}, {pipeline_mode = #tpu.pipeline_mode<synchronous>, transform_indices = @transform_2, window_bounds = array<i64: 1, 32>}, {pipeline_mode = #tpu.pipeline_mode<synchronous>, transform_indices = @transform_3, window_bounds = array<i64: 128, 32>}, {pipeline_mode = #tpu.pipeline_mode<synchronous>, transform_indices = @transform_4, window_bounds = array<i64: 32, 128>}, {pipeline_mode = #tpu.pipeline_mode<synchronous>, transform_indices = @transform_5, window_bounds = array<i64: 1, 128>}, {transform_indices = @transform_6, window_bounds = array<i64: 3, 8, 128>}]} {
    %c0 = arith.constant 0 : index
    %c0_0 = arith.constant 0 : index
    %0 = vector.load %arg1[%c0, %c0_0] : memref<8x32xf32, #tpu.memory_space<vmem>>, vector<8x32xf32>
    %c0_1 = arith.constant 0 : index
    %c0_2 = arith.constant 0 : index
    %1 = vector.load %arg2[%c0_1, %c0_2] : memref<32x32xf32, #tpu.memory_space<vmem>>, vector<32x32xf32>
    %cst = arith.constant dense<0.000000e+00> : vector<8x32xf32>
    %2 = tpu.matmul %0, %1, %cst {dimension_numbers = #tpu.dot_dimension_numbers<[1], [0], [0], [1], [0, 0, 1, 1], [], []>} : vector<8x32xf32>, vector<32x32xf32>, vector<8x32xf32> -> vector<8x32xf32>
    %c0_3 = arith.constant 0 : index
    %c0_4 = arith.constant 0 : index
    %3 = vector.load %arg3[%c0_3, %c0_4] : memref<1x32xf32, #tpu.memory_space<vmem>>, vector<1x32xf32>
    %4 = vector.broadcast %3 : vector<1x32xf32> to vector<8x32xf32>
    %5 = arith.addf %2, %4 : vector<8x32xf32>
    %c0_5 = arith.constant 0 : index
    %c0_6 = arith.constant 0 : index
    %6 = vector.load %arg4[%c0_5, %c0_6] : memref<128x32xf32, #tpu.memory_space<vmem>>, vector<128x32xf32>
    %c0_7 = arith.constant 0 : index
    %c0_8 = arith.constant 0 : index
    %7 = vector.load %arg5[%c0_7, %c0_8] : memref<32x128xf32, #tpu.memory_space<vmem>>, vector<32x128xf32>
    %c0_9 = arith.constant 0 : index
    %c0_10 = arith.constant 0 : index
    %8 = vector.load %arg6[%c0_9, %c0_10] : memref<1x128xf32, #tpu.memory_space<vmem>>, vector<1x128xf32>
    %9 = math.tanh %5 : vector<8x32xf32>
    %cst_11 = arith.constant dense<0.000000e+00> : vector<8x128xf32>
    %10 = tpu.matmul %9, %7, %cst_11 {dimension_numbers = #tpu.dot_dimension_numbers<[1], [0], [0], [1], [0, 0, 1, 1], [], []>} : vector<8x32xf32>, vector<32x128xf32>, vector<8x128xf32> -> vector<8x128xf32>
    %11 = vector.broadcast %8 : vector<1x128xf32> to vector<8x128xf32>
    %12 = arith.addf %10, %11 : vector<8x128xf32>
    %c0_12 = arith.constant 0 : index
    %c0_13 = arith.constant 0 : index
    %c0_14 = arith.constant 0 : index
    %13 = vector.load %arg7[%c0_12, %c0_13, %c0_14] : memref<3x8x128xf32, #tpu.memory_space<vmem>>, vector<1x8x128xf32>
    %14 = vector.shape_cast %13 : vector<1x8x128xf32> to vector<8x128xf32>
    %15 = vector.shape_cast %12 : vector<8x128xf32> to vector<1x8x128xf32>
    tpu.vector_store %arg7[%c0_12, %c0_13, %c0_14], %15 {strides = array<i32>} : memref<3x8x128xf32, #tpu.memory_space<vmem>>, vector<1x8x128xf32>,
    %cst_15 = arith.constant dense<0.000000e+00> : vector<8x32xf32>
    %16 = tpu.matmul %12, %6, %cst_15 {dimension_numbers = #tpu.dot_dimension_numbers<[1], [0], [0], [1], [0, 0, 1, 1], [], []>} : vector<8x128xf32>, vector<128x32xf32>, vector<8x32xf32> -> vector<8x32xf32>
    %17 = arith.addf %5, %16 : vector<8x32xf32>
    %18 = math.tanh %17 : vector<8x32xf32>
    %cst_16 = arith.constant dense<0.000000e+00> : vector<8x128xf32>
    %19 = tpu.matmul %18, %7, %cst_16 {dimension_numbers = #tpu.dot_dimension_numbers<[1], [0], [0], [1], [0, 0, 1, 1], [], []>} : vector<8x32xf32>, vector<32x128xf32>, vector<8x128xf32> -> vector<8x128xf32>
    %20 = vector.broadcast %8 : vector<1x128xf32> to vector<8x128xf32>
    %21 = arith.addf %19, %20 : vector<8x128xf32>
    %c1 = arith.constant 1 : index
    %c0_17 = arith.constant 0 : index
    %c0_18 = arith.constant 0 : index
    %22 = vector.load %arg7[%c1, %c0_17, %c0_18] : memref<3x8x128xf32, #tpu.memory_space<vmem>>, vector<1x8x128xf32>
    %23 = vector.shape_cast %22 : vector<1x8x128xf32> to vector<8x128xf32>
    %24 = vector.shape_cast %21 : vector<8x128xf32> to vector<1x8x128xf32>
    tpu.vector_store %arg7[%c1, %c0_17, %c0_18], %24 {strides = array<i32>} : memref<3x8x128xf32, #tpu.memory_space<vmem>>, vector<1x8x128xf32>,
    %cst_19 = arith.constant dense<0.000000e+00> : vector<8x32xf32>
    %25 = tpu.matmul %21, %6, %cst_19 {dimension_numbers = #tpu.dot_dimension_numbers<[1], [0], [0], [1], [0, 0, 1, 1], [], []>} : vector<8x128xf32>, vector<128x32xf32>, vector<8x32xf32> -> vector<8x32xf32>
    %26 = arith.addf %5, %25 : vector<8x32xf32>
    %27 = math.tanh %26 : vector<8x32xf32>
    %cst_20 = arith.constant dense<0.000000e+00> : vector<8x128xf32>
    %28 = tpu.matmul %27, %7, %cst_20 {dimension_numbers = #tpu.dot_dimension_numbers<[1], [0], [0], [1], [0, 0, 1, 1], [], []>} : vector<8x32xf32>, vector<32x128xf32>, vector<8x128xf32> -> vector<8x128xf32>
    %29 = vector.broadcast %8 : vector<1x128xf32> to vector<8x128xf32>
    %30 = arith.addf %28, %29 : vector<8x128xf32>
    %c2 = arith.constant 2 : index
    %c0_21 = arith.constant 0 : index
    %c0_22 = arith.constant 0 : index
    %31 = vector.load %arg7[%c2, %c0_21, %c0_22] : memref<3x8x128xf32, #tpu.memory_space<vmem>>, vector<1x8x128xf32>
    %32 = vector.shape_cast %31 : vector<1x8x128xf32> to vector<8x128xf32>
    %33 = vector.shape_cast %30 : vector<8x128xf32> to vector<1x8x128xf32>
    tpu.vector_store %arg7[%c2, %c0_21, %c0_22], %33 {strides = array<i32>} : memref<3x8x128xf32, #tpu.memory_space<vmem>>, vector<1x8x128xf32>,
    return
  }
  func.func @transform_0(%arg0: i32) -> (i32, i32) {
    %c0_i32 = arith.constant 0 : i32
    %c0_i32_0 = arith.constant 0 : i32
    return %arg0, %c0_i32 : i32, i32
  }
  func.func @transform_1(%arg0: i32) -> (i32, i32) {
    %c0_i32 = arith.constant 0 : i32
    %c0_i32_0 = arith.constant 0 : i32
    %c0_i32_1 = arith.constant 0 : i32
    return %c0_i32, %c0_i32_0 : i32, i32
  }
  func.func @transform_2(%arg0: i32) -> (i32, i32) {
    %c0_i32 = arith.constant 0 : i32
    %c0_i32_0 = arith.constant 0 : i32
    %c0_i32_1 = arith.constant 0 : i32
    return %c0_i32, %c0_i32_0 : i32, i32
  }
  func.func @transform_3(%arg0: i32) -> (i32, i32) {
    %c0_i32 = arith.constant 0 : i32
    %c0_i32_0 = arith.constant 0 : i32
    %c0_i32_1 = arith.constant 0 : i32
    return %c0_i32, %c0_i32_0 : i32, i32
  }
  func.func @transform_4(%arg0: i32) -> (i32, i32) {
    %c0_i32 = arith.constant 0 : i32
    %c0_i32_0 = arith.constant 0 : i32
    %c0_i32_1 = arith.constant 0 : i32
    return %c0_i32, %c0_i32_0 : i32, i32
  }
  func.func @transform_5(%arg0: i32) -> (i32, i32) {
    %c0_i32 = arith.constant 0 : i32
    %c0_i32_0 = arith.constant 0 : i32
    %c0_i32_1 = arith.constant 0 : i32
    return %c0_i32, %c0_i32_0 : i32, i32
  }
  func.func @transform_6(%arg0: i32) -> (i32, i32, i32) {
    %c0_i32 = arith.constant 0 : i32
    %c0_i32_0 = arith.constant 0 : i32
    %c0_i32_1 = arith.constant 0 : i32
    return %c0_i32, %arg0, %c0_i32_0 : i32, i32, i32
  }
}

</mosaic_0001>

<bundles_post_ra>
// kernel: _forward_impl.1
= control target key start
LH: loop header
LB: loop body
LE: loop exit
PB: predicated region body
PF: predicated region fallthrough
CT: control target
= control target key end

     0   :  { %v693_v0 = vmov 0.0   ;;  %vm694_vm0 = vmmov 0   ;;  %vm35_vm1 = vcmask 261120   ;;  %s970_s1 = inlined_call_operand.vmem [shape: f32[32,32], index: 1, kind: input, shape index: {}]   ;;  %s971_s0 = inlined_call_operand.vmem [shape: f32[8,32], index: 0, kind: input, shape index: {}]   ;;  %s972_s4 = inlined_call_operand.vmem [shape: f32[32,128], index: 4, kind: input, shape index: {}]   ;;  %s973_s3 = inlined_call_operand.vmem [shape: f32[128,32], index: 3, kind: input, shape index: {}]   ;;  %s974_s2 = inlined_call_operand.vmem [shape: f32[1,32], index: 2, kind: input, shape index: {}]   ;;  %s975_s5 = inlined_call_operand.vmem [shape: f32[1,128], index: 5, kind: input, shape index: {}]   ;;  %s976_s6 = inlined_call_operand.vmem [shape: f32[3,8,128], index: 6, kind: output, shape index: {}]  }
   0x1   :  { %571 = vmatprep.subr.mxu0 %v693_v0  ;;  %v27_v1 = vld [vmem:[%s970_s1 + $0x18] sm:$0xff]  ;;  %v26_v2 = vld [vmem:[%s970_s1 + $0x10] sm:$0xff]  ;;  %579 = vmatprep.mubr.msk.f32.mxu0 %vm694_vm0, %v693_v0  ;;  %v25_v3 = vld [vmem:[%s970_s1 + $0x8] sm:$0xff] }
   0x2   :  { %572 = vmatpush3.msra.mxu0 %v27_v1  ;;  %582 = vmatprep.subr.mxu1 %v693_v0  ;;  %v24_v4 = vld [vmem:[%s970_s1] sm:$0xff]  ;;  %v761_v6 = vld [vmem:[%s972_s4 + $0x18] sm:$0xff]  ;;  %v766_v7 = vld [vmem:[%s972_s4 + $0x10] sm:$0xff] }
   0x3   :  { %573 = vmatprep.subr.mxu0 %v693_v0  ;;  %590 = vmatprep.mubr.msk.f32.mxu1 %vm694_vm0, %v693_v0  ;;  %v23_v5 = vld [vmem:[%s971_s0] sm:$0xff]  ;;  %v773_v8 = vld [vmem:[%s972_s4 + $0x8] sm:$0xff]  ;;  %v789_v10 = vld [vmem:[%s973_s3 + $0x78] sm:$0xff] }
   0x4   :  { %574 = vmatpush3.msra.mxu0 %v26_v2  ;;  %583 = vmatpush3.msra.mxu1 %v761_v6  ;;  %v780_v9 = vld [vmem:[%s972_s4] sm:$0xff]  ;;  %v794_v11 = vld [vmem:[%s973_s3 + $0x70] sm:$0xff]  ;;  %v801_v12 = vld [vmem:[%s973_s3 + $0x68] sm:$0xff] }
   0x5   :  { %575 = vmatprep.subr.mxu0 %v693_v0  ;;  %584 = vmatprep.subr.mxu1 %v693_v0  ;;  %v808_v13 = vld [vmem:[%s973_s3 + $0x60] sm:$0xff]  ;;  %v815_v14 = vld [vmem:[%s973_s3 + $0x58] sm:$0xff]  ;;  %v822_v15 = vld [vmem:[%s973_s3 + $0x50] sm:$0xff] }
   0x6   :  { %576 = vmatpush3.msra.mxu0 %v25_v3  ;;  %585 = vmatpush3.msra.mxu1 %v766_v7  ;;  %v829_v16 = vld [vmem:[%s973_s3 + $0x48] sm:$0xff]  ;;  %v836_v17 = vld [vmem:[%s973_s3 + $0x40] sm:$0xff]  ;;  %v843_v18 = vld [vmem:[%s973_s3 + $0x38] sm:$0xff] }
   0x7   :  { %577 = vmatprep.subr.mxu0 %v693_v0  ;;  %586 = vmatprep.subr.mxu1 %v693_v0  ;;  %v850_v19 = vld [vmem:[%s973_s3 + $0x30] sm:$0xff]  ;;  %v857_v20 = vld [vmem:[%s973_s3 + $0x28] sm:$0xff]  ;;  %v864_v21 = vld [vmem:[%s973_s3 + $0x20] sm:$0xff] }
   0x8   :  { %578 = vmatpush3.msra.mxu0 %v24_v4  ;;  %587 = vmatpush3.msra.mxu1 %v773_v8  ;;  %v871_v22 = vld [vmem:[%s973_s3 + $0x18] sm:$0xff]  ;;  %v878_v23 = vld [vmem:[%s973_s3 + $0x10] sm:$0xff]  ;;  %v509_v24 = vld [vmem:[%s974_s2] ss:$0 sm:$0xff] }
   0x9   :  { %580 = vmatmul.mubr.msk.f32.vlgmr.msra.gmra.mxu0 %vm35_vm1, %v23_v5  ;;  %593 = vmatprep.subr.mxu0 %v693_v0  ;;  %v110_v29 = vld [vmem:[%s973_s3 + $0x8] sm:$0xff]  ;;  %v109_v30 = vld [vmem:[%s973_s3] sm:$0xff] }
   0xa   :  { %625 = vmatprep.mubr.msk.f32.mxu0 %vm694_vm0, %v693_v0  ;;  %588 = vmatprep.subr.mxu1 %v693_v0  ;;  %v912_v31 = vld [vmem:[%s975_s5] ss:$0 sm:$0xff] }
   0xb   :  { %589 = vmatpush3.msra.mxu1 %v780_v9  ;;  %594 = vmatpush3.msra.mxu0 %v789_v10 }
   0xc   :  { %628 = vmatprep.subr.mxu1 %v693_v0  ;;  %595 = vmatprep.subr.mxu0 %v693_v0 }
   0xd   :  { %596 = vmatpush3.msra.mxu0 %v794_v11 }
   0xe   :  { %597 = vmatprep.subr.mxu0 %v693_v0 }
   0xf   :  { %598 = vmatpush3.msra.mxu0 %v801_v12 }
  0x10   :  { %599 = vmatprep.subr.mxu0 %v693_v0 }
  0x11   :  { %600 = vmatpush3.msra.mxu0 %v808_v13 }
  0x12   :  { %601 = vmatprep.subr.mxu0 %v693_v0 }
  0x13   :  { %602 = vmatpush3.msra.mxu0 %v815_v14 }
  0x14   :  { %603 = vmatprep.subr.mxu0 %v693_v0 }
  0x15   :  { %604 = vmatpush3.msra.mxu0 %v822_v15 }
  0x16   :  { %605 = vmatprep.subr.mxu0 %v693_v0 }
  0x17   :  { %606 = vmatpush3.msra.mxu0 %v829_v16 }
  0x18   :  { %607 = vmatprep.subr.mxu0 %v693_v0 }
  0x19   :  { %608 = vmatpush3.msra.mxu0 %v836_v17 }
  0x1a   :  { %609 = vmatprep.subr.mxu0 %v693_v0 }
  0x1b   :  { %610 = vmatpush3.msra.mxu0 %v843_v18 }
  0x1c   :  { %611 = vmatprep.subr.mxu0 %v693_v0 }
  0x1d   :  { %612 = vmatpush3.msra.mxu0 %v850_v19 }
  0x1e   :  { %613 = vmatprep.subr.mxu0 %v693_v0 }
  0x1f   :  { %614 = vmatpush3.msra.mxu0 %v857_v20 }
  0x20   :  { %615 = vmatprep.subr.mxu0 %v693_v0 }
  0x21   :  { %616 = vmatpush3.msra.mxu0 %v864_v21 }
  0x22   :  { %617 = vmatprep.subr.mxu0 %v693_v0 }
  0x23   :  { %618 = vmatpush3.msra.mxu0 %v871_v22 }
  0x24   :  { %619 = vmatprep.subr.mxu0 %v693_v0 }
  0x25   :  { %620 = vmatpush3.msra.mxu0 %v878_v23 }
  0x26   :  { %621 = vmatprep.subr.mxu0 %v693_v0 }
  0x27   :  { %622 = vmatpush3.msra.mxu0 %v110_v29 }
  0x28   :  { %623 = vmatprep.subr.mxu0 %v693_v0 }
  0x29   :  { %624 = vmatpush3.msra.mxu0 %v109_v30 }
  0x2a   :  { %674 = vmatprep.subr.mxu0 %v693_v0 }
  0xc9   :  { %v105_v25 = vpop.f32.mrf.mxu0 }
  0xca   :  { %v887_v26 = vadd.f32 %v509_v24, %v105_v25 }
  0xcb   :  { %v581_v27 = vpop.f32.mrf.mxu0 }
  0xcc   :  { %687 = vtanh.f32 %v887_v26 }
  0xd9   :  { %v688_v28 = vpop.eup %687 }
  0xda   :  { %591 = vmatmul.mubr.msk.f32.vlgmr.msra.gmra.mxu1 %vm35_vm1, %v688_v28 }
  0xdb   :  { %629 = vmatpush3.msra.mxu1 %v761_v6  ;;  %636 = vmatprep.mubr.msk.f32.mxu1 %vm694_vm0, %v693_v0 }
  0xdc   :  { %630 = vmatprep.subr.mxu1 %v693_v0 }
  0xdd   :  { %631 = vmatpush3.msra.mxu1 %v766_v7 }
  0xde   :  { %632 = vmatprep.subr.mxu1 %v693_v0 }
  0xdf   :  { %633 = vmatpush3.msra.mxu1 %v773_v8 }
  0xe0   :  { %634 = vmatprep.subr.mxu1 %v693_v0 }
  0xe1   :  { %635 = vmatpush3.msra.mxu1 %v780_v9 }
  0xe2   :  { %639 = vmatprep.subr.mxu1 %v693_v0 }
 0x19a   :  { %v206_v32 = vpop.f32.mrf.mxu1 }
 0x19b   :  { %v207_v33 = vadd.f32 %v912_v31, %v206_v32 }
 0x19c   :  { %v592_v34 = vpop.f32.mrf.mxu1 }
 0x19d   :  { %210 = vst [vmem:[%s976_s6] sm:$0xff] %v207_v33  ;;  %626 = vmatmul.mubr.f32.vlgmr.msra.gmra.mxu0 %v207_v33 }
 0x19e   :  { %675 = vmatpush3.msra.mxu0 %v761_v6  ;;  %682 = vmatprep.mubr.msk.f32.mxu0 %vm694_vm0, %v693_v0 }
 0x19f   :  { %676 = vmatprep.subr.mxu0 %v693_v0 }
 0x1a0   :  { %677 = vmatpush3.msra.mxu0 %v766_v7 }
 0x1a1   :  { %678 = vmatprep.subr.mxu0 %v693_v0 }
 0x1a2   :  { %679 = vmatpush3.msra.mxu0 %v773_v8 }
 0x1a3   :  { %680 = vmatprep.subr.mxu0 %v693_v0 }
 0x1a4   :  { %681 = vmatpush3.msra.mxu0 %v780_v9 }
 0x25d   :  { %v277_v35 = vpop.f32.mrf.mxu0 }
 0x25e   :  { %v281_v36 = vadd.f32 %v277_v35, %v887_v26 }
 0x25f   :  { %v627_v37 = vpop.f32.mrf.mxu0 }
 0x260   :  { %689 = vtanh.f32 %v281_v36 }
 0x26d   :  { %v690_v38 = vpop.eup %689 }
 0x26e   :  { %637 = vmatmul.mubr.msk.f32.vlgmr.msra.gmra.mxu1 %vm35_vm1, %v690_v38 }
 0x26f   :  { %640 = vmatpush3.msra.mxu1 %v789_v10  ;;  %671 = vmatprep.mubr.msk.f32.mxu1 %vm694_vm0, %v693_v0 }
 0x270   :  { %641 = vmatprep.subr.mxu1 %v693_v0 }
 0x271   :  { %642 = vmatpush3.msra.mxu1 %v794_v11 }
 0x272   :  { %643 = vmatprep.subr.mxu1 %v693_v0 }
 0x273   :  { %644 = vmatpush3.msra.mxu1 %v801_v12 }
 0x274   :  { %645 = vmatprep.subr.mxu1 %v693_v0 }
 0x275   :  { %646 = vmatpush3.msra.mxu1 %v808_v13 }
 0x276   :  { %647 = vmatprep.subr.mxu1 %v693_v0 }
 0x277   :  { %648 = vmatpush3.msra.mxu1 %v815_v14 }
 0x278   :  { %649 = vmatprep.subr.mxu1 %v693_v0 }
 0x279   :  { %650 = vmatpush3.msra.mxu1 %v822_v15 }
 0x27a   :  { %651 = vmatprep.subr.mxu1 %v693_v0 }
 0x27b   :  { %652 = vmatpush3.msra.mxu1 %v829_v16 }
 0x27c   :  { %653 = vmatprep.subr.mxu1 %v693_v0 }
 0x27d   :  { %654 = vmatpush3.msra.mxu1 %v836_v17 }
 0x27e   :  { %655 = vmatprep.subr.mxu1 %v693_v0 }
 0x27f   :  { %656 = vmatpush3.msra.mxu1 %v843_v18 }
 0x280   :  { %657 = vmatprep.subr.mxu1 %v693_v0 }
 0x281   :  { %658 = vmatpush3.msra.mxu1 %v850_v19 }
 0x282   :  { %659 = vmatprep.subr.mxu1 %v693_v0 }
 0x283   :  { %660 = vmatpush3.msra.mxu1 %v857_v20 }
 0x284   :  { %661 = vmatprep.subr.mxu1 %v693_v0 }
 0x285   :  { %662 = vmatpush3.msra.mxu1 %v864_v21 }
 0x286   :  { %663 = vmatprep.subr.mxu1 %v693_v0 }
 0x287   :  { %664 = vmatpush3.msra.mxu1 %v871_v22 }
 0x288   :  { %665 = vmatprep.subr.mxu1 %v693_v0 }
 0x289   :  { %666 = vmatpush3.msra.mxu1 %v878_v23 }
 0x28a   :  { %667 = vmatprep.subr.mxu1 %v693_v0 }
 0x28b   :  { %668 = vmatpush3.msra.mxu1 %v110_v29 }
 0x28c   :  { %669 = vmatprep.subr.mxu1 %v693_v0 }
 0x28d   :  { %670 = vmatpush3.msra.mxu1 %v109_v30 }
 0x32e   :  { %v352_v39 = vpop.f32.mrf.mxu1 }
 0x32f   :  { %v353_v40 = vadd.f32 %v912_v31, %v352_v39 }
 0x330   :  { %v638_v41 = vpop.f32.mrf.mxu1 }
 0x331   :  { %514 = vst [vmem:[%s976_s6 + $0x8] sm:$0xff] %v353_v40  ;;  %672 = vmatmul.mubr.f32.vlgmr.msra.gmra.mxu1 %v353_v40 }
 0x3f1   :  { %v424_v42 = vpop.f32.mrf.mxu1 }
 0x3f2   :  { %v428_v43 = vadd.f32 %v424_v42, %v887_v26 }
 0x3f3   :  { %v673_v44 = vpop.f32.mrf.mxu1 }
 0x3f4   :  { %691 = vtanh.f32 %v428_v43 }
 0x401   :  { %v692_v45 = vpop.eup %691 }
 0x402   :  { %683 = vmatmul.mubr.msk.f32.vlgmr.msra.gmra.mxu0 %vm35_vm1, %v692_v45 }
 0x4c2   :  { %v499_v46 = vpop.f32.mrf.mxu0 }
 0x4c3   :  { %v500_v47 = vadd.f32 %v912_v31, %v499_v46 }
 0x4c4   :  { %v684_v48 = vpop.f32.mrf.mxu0 }
 0x4c5   :  { %516 = vst [vmem:[%s976_s6 + $0x10] sm:$0xff] %v500_v47 }

</bundles_post_ra>
